<compile_context>
chip_gen: v5e
topology: v5e:2x2
jax: 0.10.0
libtpu: 0.0.40
codegen_flags: <defaults>
</compile_context>

<pallas_src>
import functools

import jax
import jax.numpy as jnp
from jax.experimental import pallas as pl
from jax.experimental.pallas import tpu as pltpu

SIGMA = 3.0
SIGMA_SQ = SIGMA ** 2          # 9.0 — used for the threshold and the linear offset
QUAD_COEF = 0.5 * 9.0          # the PyTorch module hard-codes 9.0 in the quadratic branch
LANES = 128


def _round_up(x, m):
    return ((x + m - 1) // m) * m


def _smooth_l1_kernel(pred_ref, tgt_ref, state_ref, expand_ref, o_ref,
                      acc_loss_ref, acc_cnt_ref, *, tile_rows, n_rows):
    """One (tile_rows, 128) lane-dense slab of the flattened pred/target.

    pred_ref/tgt_ref : (tile_rows, 128)   flattened regression values
    state_ref        : (tile_rows, A)     per-anchor state, A = 128 // D anchors per row
    expand_ref       : (A, 128)           exact 0/1 matrix: expand[a, l] = (l // D == a)
    o_ref            : (1, 8, 128)        per-core partials: loss sum @ lane 0, count @ lane 1
    """
    i = pl.program_id(1)

    @pl.when(i == 0)
    def _init():
        acc_loss_ref[...] = jnp.zeros_like(acc_loss_ref)
        acc_cnt_ref[...] = jnp.zeros_like(acc_cnt_ref)

    # Row block handled by this step (may be a duplicated / partial tail block — its
    # contribution is zeroed by the validity masks below).
    block_id = pl.program_id(0) * pl.num_programs(1) + i
    row0 = block_id * tile_rows

    pred = pred_ref[...].astype(jnp.float32)
    tgt = tgt_ref[...].astype(jnp.float32)
    diff = jnp.abs(pred - tgt)
    loss = jnp.where(diff <= (1.0 / SIGMA_SQ),
                     QUAD_COEF * diff * diff,
                     diff - 0.5 / SIGMA_SQ)

    # Kill rows past the real data (stale VMEM in a partial tile could even hold NaN/Inf).
    valid_e = (row0 + jax.lax.broadcasted_iota(jnp.int32, loss.shape, 0)) < n_rows
    loss = jnp.where(valid_e, loss, 0.0)

    # Per-anchor positive mask (anchor_state == 1), also killed on invalid rows.
    state = state_ref[...].astype(jnp.float32)
    valid_a = (row0 + jax.lax.broadcasted_iota(jnp.int32, state.shape, 0)) < n_rows
    pos = jnp.where(jnp.logical_and(state == 1.0, valid_a), 1.0, 0.0)

    # Expand the per-anchor mask to per-element lanes on the idle MXU.  `expand`
    # contains exact 0/1 values, so the matmul is exact at any MXU precision.
    mask = jnp.dot(pos, expand_ref[...], preferred_element_type=jnp.float32)

    # Hot loop: pure per-lane VPU adds into VMEM accumulators.
    acc_loss_ref[...] += loss * mask
    acc_cnt_ref[...] += pos

    @pl.when(i == pl.num_programs(1) - 1)
    def _finalize():
        loss_sum = jnp.sum(acc_loss_ref[...])
        cnt = jnp.sum(acc_cnt_ref[...])
        sub = jax.lax.broadcasted_iota(jnp.int32, o_ref.shape, 1)
        lane = jax.lax.broadcasted_iota(jnp.int32, o_ref.shape, 2)
        o_ref[...] = jnp.where(jnp.logical_and(sub == 0, lane == 0), loss_sum,
                               jnp.where(jnp.logical_and(sub == 0, lane == 1), cnt, 0.0))


@functools.partial(jax.jit, static_argnames=("tile_rows",))
def smooth_l1_loss(y_pred, y_true, tile_rows=2048):
    N, D = y_pred.shape
    assert y_true.shape == (N, D + 1)
    assert LANES % D == 0, "D must divide 128"  # TODO(synk): pad D for non-divisor targets
    A = LANES // D  # anchors per 128-element row

    # Split y_true in the wrapper (cheap XLA slices) instead of slicing inside the kernel.
    target = y_true[:, :D]
    state = y_true[:, D]

    # Pad only when the free lane-dense reshape requires it (N % A != 0).  Padded
    # anchors have state 0 and contribute nothing.
    pad = (-N) % A
    if pad:
        y_pred = jnp.pad(y_pred, ((0, pad), (0, 0)))
        target = jnp.pad(target, ((0, pad), (0, 0)))
        state = jnp.pad(state, ((0, pad),))
    n_rows = (N + pad) // A  # rows of 128 contiguous elements

    # Free (contiguous) reshapes to a lane-dense layout: last dim = 128.
    pred_flat = y_pred.reshape(n_rows, LANES)
    tgt_flat = target.reshape(n_rows, LANES)
    state_2d = state.reshape(n_rows, A)

    # Exact 0/1 expansion matrix: expand[a, l] = 1 iff l // D == a.
    expand = (jax.lax.broadcasted_iota(jnp.int32, (A, LANES), 1) // D
              == jax.lax.broadcasted_iota(jnp.int32, (A, LANES), 0)).astype(jnp.float32)

    tile = min(tile_rows, _round_up(max(n_rows, 1), 8))
    n_blocks = pl.cdiv(n_rows, tile)
    n_outer = 2 if n_blocks >= 2 else 1          # shard rows across v7x's 2 TensorCores
    n_inner = pl.cdiv(n_blocks, n_outer)

    def row_block(c, i):
        # Clamp so a duplicated tail step never DMAs fully out of bounds; its
        # contribution is zeroed by the in-kernel validity mask.
        return (jnp.minimum(c * n_inner + i, n_blocks - 1), 0)

    kernel = functools.partial(_smooth_l1_kernel, tile_rows=tile, n_rows=n_rows)

    parts = pl.pallas_call(
        kernel,
        out_shape=jax.ShapeDtypeStruct((n_outer, 8, LANES), jnp.float32),
        grid_spec=pltpu.PrefetchScalarGridSpec(
            num_scalar_prefetch=0,
            grid=(n_outer, n_inner),
            in_specs=[
                pl.BlockSpec((tile, LANES), row_block),          # pred
                pl.BlockSpec((tile, LANES), row_block),          # target
                pl.BlockSpec((tile, A), row_block),              # anchor state
                pl.BlockSpec((A, LANES), lambda c, i: (0, 0)),   # mask-expansion matrix
            ],
            out_specs=pl.BlockSpec((1, 8, LANES), lambda c, i: (c, 0, 0)),
            scratch_shapes=[
                pltpu.VMEM((tile, LANES), jnp.float32),  # masked-loss accumulator
                pltpu.VMEM((tile, A), jnp.float32),      # positive-anchor count accumulator
            ],
        ),
        compiler_params=pltpu.CompilerParams(
            dimension_semantics=("parallel", "arbitrary")),
    )(pred_flat, tgt_flat, state_2d, expand)

    loss_sum = jnp.sum(parts[:, 0, 0])
    normalizer = jnp.maximum(jnp.sum(parts[:, 0, 1]), 1.0)
    return loss_sum / normalizer


def _reference(y_pred, y_true):
    target = y_true[:, :-1]
    state = y_true[:, -1]
    mask = (state == 1.0).astype(jnp.float32)
    diff = jnp.abs(y_pred - target)
    loss = jnp.where(diff <= 1.0 / SIGMA_SQ,
                     QUAD_COEF * diff * diff,
                     diff - 0.5 / SIGMA_SQ)
    loss_all = jnp.sum(loss * mask[:, None])
    normalizer = jnp.maximum(jnp.sum(mask), 1.0)
    return loss_all / normalizer


if __name__ == "__main__":
    key = jax.random.PRNGKey(0)

    def make_inputs(k, n, d):
        k1, k2, k3 = jax.random.split(k, 3)
        y_pred = jax.random.normal(k1, (n, d), dtype=jnp.float32)
        target = jax.random.normal(k2, (n, d), dtype=jnp.float32)
        # anchor states in {-1, 0, 1}; only rows with state == 1 contribute
        state = jax.random.randint(k3, (n, 1), minval=-1, maxval=2).astype(jnp.float32)
        return y_pred, jnp.concatenate([target, state], axis=1)

    ka, kb = jax.random.split(key)

    # Small case (typical D=4 regression targets).
    y_pred, y_true = make_inputs(ka, 64, 4)
    out = smooth_l1_loss(y_pred, y_true)
    jax.block_until_ready(out)
    ref = _reference(y_pred, y_true)
    assert jnp.allclose(out, ref, rtol=1e-5, atol=1e-5), (out, ref)

    # Exercise padding, multi-block grid, the 2-way core split and the partial tail tile.
    y_pred2, y_true2 = make_inputs(kb, 1100, 4)
    out2 = smooth_l1_loss(y_pred2, y_true2, tile_rows=8)
    jax.block_until_ready(out2)
    ref2 = _reference(y_pred2, y_true2)
    assert jnp.allclose(out2, ref2, rtol=1e-5, atol=1e-5), (out2, ref2)

    print("KERNEL_OK")
</pallas_src>

<mosaic_0001>
module attributes {stable_mosaic.version = 11 : i64} {
  func.func @_smooth_l1_kernel(%arg0: i32, %arg1: i32, %arg2: memref<8x128xf32, #tpu.memory_space<vmem>>, %arg3: memref<8x128xf32, #tpu.memory_space<vmem>>, %arg4: memref<8x32xf32, #tpu.memory_space<vmem>>, %arg5: memref<32x128xf32, #tpu.memory_space<vmem>>, %arg6: memref<1x8x128xf32, #tpu.memory_space<vmem>>, %arg7: memref<8x128xf32, #tpu.memory_space<vmem>>, %arg8: memref<8x32xf32, #tpu.memory_space<vmem>>) attributes {dimension_semantics = [#tpu.dimension_semantics<parallel>, #tpu.dimension_semantics<arbitrary>], iteration_bounds = array<i64: 1, 1>, scalar_prefetch = 0 : i64, scratch_operands = 2 : i64, tpu.core_type = #tpu.core_type<tc>, window_params = [{transform_indices = @transform_0, window_bounds = array<i64: 8, 128>}, {transform_indices = @transform_1, window_bounds = array<i64: 8, 128>}, {transform_indices = @transform_2, window_bounds = array<i64: 8, 32>}, {pipeline_mode = #tpu.pipeline_mode<synchronous>, transform_indices = @transform_3, window_bounds = array<i64: 32, 128>}, {transform_indices = @transform_4, window_bounds = array<i64: 1, 8, 128>}]} {
    %c0_i32 = arith.constant 0 : i32
    %0 = arith.cmpi eq, %arg1, %c0_i32 : i32
    %1 = arith.extui %0 : i1 to i32
    %c0_i32_0 = arith.constant 0 : i32
    %2 = arith.cmpi ne, %1, %c0_i32_0 : i32
    scf.if %2 {
      %cst_26 = arith.constant 0.000000e+00 : f32
      %49 = vector.broadcast %cst_26 : f32 to vector<8x128xf32>
      %c0_27 = arith.constant 0 : index
      %c0_28 = arith.constant 0 : index
      %50 = vector.load %arg7[%c0_27, %c0_28] : memref<8x128xf32, #tpu.memory_space<vmem>>, vector<8x128xf32>
      tpu.vector_store %arg7[%c0_27, %c0_28], %49 {strides = array<i32>} : memref<8x128xf32, #tpu.memory_space<vmem>>, vector<8x128xf32>,
      %cst_29 = arith.constant 0.000000e+00 : f32
      %51 = vector.broadcast %cst_29 : f32 to vector<8x32xf32>
      %c0_30 = arith.constant 0 : index
      %c0_31 = arith.constant 0 : index
      %52 = vector.load %arg8[%c0_30, %c0_31] : memref<8x32xf32, #tpu.memory_space<vmem>>, vector<8x32xf32>
      tpu.vector_store %arg8[%c0_30, %c0_31], %51 {strides = array<i32>} : memref<8x32xf32, #tpu.memory_space<vmem>>, vector<8x32xf32>,
    } else {
    }
    %c1_i32 = arith.constant 1 : i32
    %3 = arith.muli %arg0, %c1_i32 : i32
    %4 = arith.addi %3, %arg1 : i32
    %c8_i32 = arith.constant 8 : i32
    %5 = arith.muli %4, %c8_i32 : i32
    %c0 = arith.constant 0 : index
    %c0_1 = arith.constant 0 : index
    %6 = vector.load %arg2[%c0, %c0_1] : memref<8x128xf32, #tpu.memory_space<vmem>>, vector<8x128xf32>
    %c0_2 = arith.constant 0 : index
    %c0_3 = arith.constant 0 : index
    %7 = vector.load %arg3[%c0_2, %c0_3] : memref<8x128xf32, #tpu.memory_space<vmem>>, vector<8x128xf32>
    %8 = arith.subf %6, %7 : vector<8x128xf32>
    %9 = math.absf %8 : vector<8x128xf32>
    %cst = arith.constant 0.111111112 : f32
    %10 = vector.broadcast %cst : f32 to vector<8x128xf32>
    %11 = arith.cmpf ole, %9, %10 : vector<8x128xf32>
    %cst_4 = arith.constant 4.500000e+00 : f32
    %12 = vector.broadcast %cst_4 : f32 to vector<8x128xf32>
    %13 = arith.mulf %12, %9 : vector<8x128xf32>
    %14 = arith.mulf %13, %9 : vector<8x128xf32>
    %cst_5 = arith.constant 0.055555556 : f32
    %15 = vector.broadcast %cst_5 : f32 to vector<8x128xf32>
    %16 = arith.subf %9, %15 : vector<8x128xf32>
    %17 = arith.select %11, %14, %16 : vector<8x128xi1>, vector<8x128xf32>
    %18 = tpu.iota {dimensions = array<i32: 0>} : vector<8x128xi32>
    %19 = vector.broadcast %5 : i32 to vector<8x128xi32>
    %20 = arith.addi %19, %18 : vector<8x128xi32>
    %c2_i32 = arith.constant 2 : i32
    %21 = vector.broadcast %c2_i32 : i32 to vector<8x128xi32>
    %22 = arith.cmpi slt, %20, %21 : vector<8x128xi32>
    %cst_6 = arith.constant 0.000000e+00 : f32
    %23 = vector.broadcast %cst_6 : f32 to vector<8x128xf32>
    %24 = arith.select %22, %17, %23 : vector<8x128xi1>, vector<8x128xf32>
    %c0_7 = arith.constant 0 : index
    %c0_8 = arith.constant 0 : index
    %25 = vector.load %arg4[%c0_7, %c0_8] : memref<8x32xf32, #tpu.memory_space<vmem>>, vector<8x32xf32>
    %26 = tpu.iota {dimensions = array<i32: 0>} : vector<8x32xi32>
    %27 = vector.broadcast %5 : i32 to vector<8x32xi32>
    %28 = arith.addi %27, %26 : vector<8x32xi32>
    %c2_i32_9 = arith.constant 2 : i32
    %29 = vector.broadcast %c2_i32_9 : i32 to vector<8x32xi32>
    %30 = arith.cmpi slt, %28, %29 : vector<8x32xi32>
    %cst_10 = arith.constant 1.000000e+00 : f32
    %31 = vector.broadcast %cst_10 : f32 to vector<8x32xf32>
    %32 = arith.cmpf oeq, %25, %31 : vector<8x32xf32>
    %33 = arith.andi %32, %30 : vector<8x32xi1>
    %cst_11 = arith.constant 1.000000e+00 : f32
    %cst_12 = arith.constant 0.000000e+00 : f32
    %34 = vector.broadcast %cst_11 : f32 to vector<8x32xf32>
    %35 = vector.broadcast %cst_12 : f32 to vector<8x32xf32>
    %36 = arith.select %33, %34, %35 : vector<8x32xi1>, vector<8x32xf32>
    %c0_13 = arith.constant 0 : index
    %c0_14 = arith.constant 0 : index
    %37 = vector.load %arg5[%c0_13, %c0_14] : memref<32x128xf32, #tpu.memory_space<vmem>>, vector<32x128xf32>
    %cst_15 = arith.constant dense<0.000000e+00> : vector<8x128xf32>
    %38 = tpu.matmul %36, %37, %cst_15 {dimension_numbers = #tpu.dot_dimension_numbers<[1], [0], [0], [1], [0, 0, 1, 1], [], []>} : vector<8x32xf32>, vector<32x128xf32>, vector<8x128xf32> -> vector<8x128xf32>
    %c0_16 = arith.constant 0 : index
    %c0_17 = arith.constant 0 : index
    %39 = vector.load %arg7[%c0_16, %c0_17] : memref<8x128xf32, #tpu.memory_space<vmem>>, vector<8x128xf32>
    %40 = arith.mulf %24, %38 : vector<8x128xf32>
    %41 = arith.addf %39, %40 : vector<8x128xf32>
    %c0_18 = arith.constant 0 : index
    %c0_19 = arith.constant 0 : index
    %42 = vector.load %arg7[%c0_18, %c0_19] : memref<8x128xf32, #tpu.memory_space<vmem>>, vector<8x128xf32>
    tpu.vector_store %arg7[%c0_18, %c0_19], %41 {strides = array<i32>} : memref<8x128xf32, #tpu.memory_space<vmem>>, vector<8x128xf32>,
    %c0_20 = arith.constant 0 : index
    %c0_21 = arith.constant 0 : index
    %43 = vector.load %arg8[%c0_20, %c0_21] : memref<8x32xf32, #tpu.memory_space<vmem>>, vector<8x32xf32>
    %44 = arith.addf %43, %36 : vector<8x32xf32>
    %c0_22 = arith.constant 0 : index
    %c0_23 = arith.constant 0 : index
    %45 = vector.load %arg8[%c0_22, %c0_23] : memref<8x32xf32, #tpu.memory_space<vmem>>, vector<8x32xf32>
    tpu.vector_store %arg8[%c0_22, %c0_23], %44 {strides = array<i32>} : memref<8x32xf32, #tpu.memory_space<vmem>>, vector<8x32xf32>,
    %c0_i32_24 = arith.constant 0 : i32
    %46 = arith.cmpi eq, %arg1, %c0_i32_24 : i32
    %47 = arith.extui %46 : i1 to i32
    %c0_i32_25 = arith.constant 0 : i32
    %48 = arith.cmpi ne, %47, %c0_i32_25 : i32
    scf.if %48 {
      %c0_26 = arith.constant 0 : index
      %c0_27 = arith.constant 0 : index
      %49 = vector.load %arg7[%c0_26, %c0_27] : memref<8x128xf32, #tpu.memory_space<vmem>>, vector<8x128xf32>
      %50 = vector.shape_cast %49 : vector<8x128xf32> to vector<1x8x128xf32>
      %cst_28 = arith.constant dense<0.000000e+00> : vector<1xf32>
      %51 = vector.multi_reduction <add>, %50, %cst_28 [1, 2] : vector<1x8x128xf32> to vector<1xf32>
      %52 = vector.shape_cast %51 : vector<1xf32> to vector<1x1x1xf32>
      %53 = vector.extract %52[0, 0, 0] : f32 from vector<1x1x1xf32>
      %c0_29 = arith.constant 0 : index
      %c0_30 = arith.constant 0 : index
      %54 = vector.load %arg8[%c0_29, %c0_30] : memref<8x32xf32, #tpu.memory_space<vmem>>, vector<8x32xf32>
      %55 = vector.shape_cast %54 : vector<8x32xf32> to vector<1x8x32xf32>
      %cst_31 = arith.constant dense<0.000000e+00> : vector<1xf32>
      %56 = vector.multi_reduction <add>, %55, %cst_31 [1, 2] : vector<1x8x32xf32> to vector<1xf32>
      %57 = vector.shape_cast %56 : vector<1xf32> to vector<1x1x1xf32>
      %58 = vector.extract %57[0, 0, 0] : f32 from vector<1x1x1xf32>
      %59 = tpu.iota {dimensions = array<i32: 1>} : vector<1x8x128xi32>
      %60 = tpu.iota {dimensions = array<i32: 2>} : vector<1x8x128xi32>
      %c0_i32_32 = arith.constant 0 : i32
      %61 = vector.broadcast %c0_i32_32 : i32 to vector<1x8x128xi32>
      %62 = arith.cmpi eq, %59, %61 : vector<1x8x128xi32>
      %c0_i32_33 = arith.constant 0 : i32
      %63 = vector.broadcast %c0_i32_33 : i32 to vector<1x8x128xi32>
      %64 = arith.cmpi eq, %60, %63 : vector<1x8x128xi32>
      %65 = arith.andi %62, %64 : vector<1x8x128xi1>
      %c0_i32_34 = arith.constant 0 : i32
      %66 = vector.broadcast %c0_i32_34 : i32 to vector<1x8x128xi32>
      %67 = arith.cmpi eq, %59, %66 : vector<1x8x128xi32>
      %c1_i32_35 = arith.constant 1 : i32
      %68 = vector.broadcast %c1_i32_35 : i32 to vector<1x8x128xi32>
      %69 = arith.cmpi eq, %60, %68 : vector<1x8x128xi32>
      %70 = arith.andi %67, %69 : vector<1x8x128xi1>
      %cst_36 = arith.constant 0.000000e+00 : f32
      %71 = vector.broadcast %58 : f32 to vector<1x8x128xf32>
      %72 = vector.broadcast %cst_36 : f32 to vector<1x8x128xf32>
      %73 = arith.select %70, %71, %72 : vector<1x8x128xi1>, vector<1x8x128xf32>
      %74 = vector.broadcast %53 : f32 to vector<1x8x128xf32>
      %75 = arith.select %65, %74, %73 : vector<1x8x128xi1>, vector<1x8x128xf32>
      %c0_37 = arith.constant 0 : index
      %c0_38 = arith.constant 0 : index
      %c0_39 = arith.constant 0 : index
      %76 = vector.load %arg6[%c0_37, %c0_38, %c0_39] : memref<1x8x128xf32, #tpu.memory_space<vmem>>, vector<1x8x128xf32>
      tpu.vector_store %arg6[%c0_37, %c0_38, %c0_39], %75 {strides = array<i32>} : memref<1x8x128xf32, #tpu.memory_space<vmem>>, vector<1x8x128xf32>,
    } else {
    }
    return
  }
  func.func @transform_0(%arg0: i32, %arg1: i32) -> (i32, i32) {
    %c1_i32 = arith.constant 1 : i32
    %0 = arith.muli %arg0, %c1_i32 : i32
    %1 = arith.addi %0, %arg1 : i32
    %c0_i32 = arith.constant 0 : i32
    %2 = arith.minsi %1, %c0_i32 : i32
    %c0_i32_0 = arith.constant 0 : i32
    %c0_i32_1 = arith.constant 0 : i32
    return %2, %c0_i32_0 : i32, i32
  }
  func.func @transform_1(%arg0: i32, %arg1: i32) -> (i32, i32) {
    %c1_i32 = arith.constant 1 : i32
    %0 = arith.muli %arg0, %c1_i32 : i32
    %1 = arith.addi %0, %arg1 : i32
    %c0_i32 = arith.constant 0 : i32
    %2 = arith.minsi %1, %c0_i32 : i32
    %c0_i32_0 = arith.constant 0 : i32
    %c0_i32_1 = arith.constant 0 : i32
    return %2, %c0_i32_0 : i32, i32
  }
  func.func @transform_2(%arg0: i32, %arg1: i32) -> (i32, i32) {
    %c1_i32 = arith.constant 1 : i32
    %0 = arith.muli %arg0, %c1_i32 : i32
    %1 = arith.addi %0, %arg1 : i32
    %c0_i32 = arith.constant 0 : i32
    %2 = arith.minsi %1, %c0_i32 : i32
    %c0_i32_0 = arith.constant 0 : i32
    %c0_i32_1 = arith.constant 0 : i32
    return %2, %c0_i32_0 : i32, i32
  }
  func.func @transform_3(%arg0: i32, %arg1: i32) -> (i32, i32) {
    %c0_i32 = arith.constant 0 : i32
    %c0_i32_0 = arith.constant 0 : i32
    %c0_i32_1 = arith.constant 0 : i32
    return %c0_i32, %c0_i32_0 : i32, i32
  }
  func.func @transform_4(%arg0: i32, %arg1: i32) -> (i32, i32, i32) {
    %c0_i32 = arith.constant 0 : i32
    %c0_i32_0 = arith.constant 0 : i32
    %c0_i32_1 = arith.constant 0 : i32
    return %arg0, %c0_i32, %c0_i32_0 : i32, i32, i32
  }
}

</mosaic_0001>

<bundles_post_ra>
// kernel: squeeze.3
= control target key start
LH: loop header
LB: loop body
LE: loop exit
PB: predicated region body
PF: predicated region fallthrough
CT: control target
= control target key end

     0   :  { %vm7_vm0 = vcmask 261120   ;;  %s39_s0 = inlined_call_operand.vmem [shape: f32[64], index: 0, kind: input, shape index: {}]   ;;  %s40_s1 = inlined_call_operand.vmem [shape: f32[2,32], index: 1, kind: output, shape index: {}]  }
   0x1   :  { %v4_v0 = vld [vmem:[%s39_s0] sm:$0x1]  ;;  %s22_s0 = smov 96  }
   0x2   :  { %5 = vst [vmem:[#allocation1] sm:$0x1] %v4_v0 }
   0x9   :  { %v9_v1 = vld [vmem:[#allocation1] sm:$0x1]  }
   0xa   :  { %v6_v2 = vld [vmem:[#allocation1] sm:$0x1]   ;;  %10 = vrot.lane.b32.xlu0 %v9_v1, %s22_s0 }
   0xb   :  { %8 = vst.msk [vmem:[#allocation0] sm:$0x1] %vm7_vm0, %v6_v2  }
  0x7c   :  { %v11_v3 = vpop.permute.xlu0 %10  }
  0x7d   :  { %14 = vst.msk [vmem:[#allocation0 + $0x1] sm:$0x1] %vm7_vm0, %v11_v3  }
  0x84   :  { %v17_v4 = vld [vmem:[#allocation0] sm:$0x3] }
  0x85   :  { %20 = vst [vmem:[%s40_s1] sm:$0x3] %v17_v4 }

// kernel: smooth_l1_loss.1
= control target key start
LH: loop header
LB: loop body
LE: loop exit
PB: predicated region body
PF: predicated region fallthrough
CT: control target
= control target key end

     0   :  { %vm148_vm0 = vcmask 261120   ;;  %v161_v0 = vlaneseq  ;;  %v271_v3 = vmov 0.0   ;;  %s327_s3 = inlined_call_operand.vmem [shape: f32[32,128], index: 3, kind: input, shape index: {}]   ;;  %s328_s2 = inlined_call_operand.vmem [shape: f32[2,32], index: 2, kind: input, shape index: {}]   ;;  %s329_s0 = inlined_call_operand.vmem [shape: f32[2,128], index: 0, kind: input, shape index: {}]   ;;  %s330_s1 = inlined_call_operand.vmem [shape: f32[2,128], index: 1, kind: input, shape index: {}]   ;;  %s331_s4 = inlined_call_operand.vmem [shape: f32[1,8,128], index: 4, kind: output, shape index: {}]  }
   0x1   :  { %v174_v1 = vld [vmem:[%s327_s3 + $0x18] sm:$0xff]  ;;  %v173_v2 = vld [vmem:[%s327_s3 + $0x10] sm:$0xff]  ;;  %149 = vst.msk [vmem:[#allocation3] sm:$0xff] %vm148_vm0, %v271_v3  ;;  %v167_v5 = vld [vmem:[%s328_s2] sm:$0xff] }
   0x2   :  { %191 = vmatpush.msra.mxu0 %v174_v1  ;;  %v162_v4 = vshrl.u32 %v161_v0, 7  ;;  %v172_v6 = vld [vmem:[%s327_s3 + $0x8] sm:$0xff]  ;;  %vm168_vm1 = vcmp.eq.f32.partialorder %v167_v5, 1.0  ;;  %v171_v7 = vld [vmem:[%s327_s3] sm:$0xff]  ;;  %v231_v38 = vand.u32 127, %v161_v0 }
   0x3   :  { %v152_v11 = vld [vmem:[%s329_s0] sm:$0xff] }
   0x4   :  { %192 = vmatpush.msra.mxu0 %v173_v2  ;;  %vm165_vm2 = vcmp.lt.s32.totalorder %v162_v4, 2  ;;  %v153_v12 = vld [vmem:[%s330_s1] sm:$0xff]  ;;  %vm232_vm5 = vcmp.eq.s32.totalorder %v162_v4, 0  ;;  %vm235_vm6 = vcmp.eq.s32.totalorder %v231_v38, 1  ;;  %vm233_vm7 = vcmp.eq.s32.totalorder %v231_v38, 0 }
   0x5   :  { %vm169_vm3 = vmand %vm168_vm1, %vm165_vm2  ;;  %v154_v13 = vsub.f32 %v152_v11, %v153_v12 }
   0x6   :  { %193 = vmatpush.msra.mxu0 %v172_v6  ;;  %v170_v8 = vsel %vm169_vm3, 1.0, %v271_v3  ;;  %vm236_vm8 = vmand %vm232_vm5, %vm235_vm6 }
   0x7   :  { %v155_v14 = vand.u32 2147483647, %v154_v13  ;;  %vm234_vm9 = vmand %vm232_vm5, %vm233_vm7 }
   0x8   :  { %194 = vmatpush.msra.mxu0 %v171_v7  ;;  %v203_v9 = vld [vmem:[#allocation3] sm:$0xff] }
   0x9   :  { %265 = vmatmul.msk.f32.vlgmr.msra.gmra.mxu0 %vm148_vm0, %v170_v8  ;;  %v204_v10 = vadd.f32 %v203_v9, %v170_v8  ;;  %v157_v15 = vmul.f32 4.5, %v155_v14  ;;  %v264_v17 = vadd.f32 -0.055555556, %v155_v14  ;;  %vm156_vm4 = vcmp.le.f32.partialorder %v155_v14, 0.11111111 }
   0xb   :  { %205 = vst.msk [vmem:[#allocation3] sm:$0xff] %vm148_vm0, %v204_v10  ;;  %v158_v16 = vmul.f32 %v157_v15, %v155_v14 }
   0xd   :  { %v160_v18 = vsel %vm156_vm4, %v158_v16, %v264_v17 }
   0xe   :  { %v166_v19 = vsel %vm165_vm2, %v160_v18, 0.0 }
  0x12   :  { %v219_v22 = vld [vmem:[#allocation3] sm:$0xff] }
  0x13   :  { %v220_v23 = vsel %vm148_vm0, %v219_v22, 0.0 }
  0x86   :  { %v196_v20 = vpop.f32.mrf.mxu0 }
  0x87   :  { %v200_v21 = vmul.f32 %v196_v20, %v166_v19 }
  0x89   :  { %210 = vadd.xlane.f32.xlu0 %v200_v21 }
  0x91   :  { %221 = vadd.xlane.f32.xlu0 %v220_v23 }
  0xfc   :  { %v211_v24 = vpop.xlane.xlu0 %210 }
  0xfd   :  { %v212_v25 = vrot.slane %v211_v24, 4 }
  0xff   :  { %v213_v26 = vadd.f32 %v212_v25, %v211_v24 }
 0x101   :  { %v214_v27 = vrot.slane %v213_v26, 2 }
 0x103   :  { %v215_v28 = vadd.f32 %v214_v27, %v213_v26 }
 0x104   :  { %v222_v29 = vpop.xlane.xlu0 %221 }
 0x105   :  { %v223_v30 = vrot.slane %v222_v29, 4  ;;  %v216_v31 = vrot.slane %v215_v28, 1 }
 0x107   :  { %v224_v32 = vadd.f32 %v223_v30, %v222_v29  ;;  %v217_v33 = vadd.f32 %v216_v31, %v215_v28 }
 0x109   :  { %v225_v34 = vrot.slane %v224_v32, 2  ;;  %266 = vpush %v217_v33 }
 0x10b   :  { %v226_v35 = vadd.f32 %v225_v34, %v224_v32 }
 0x10d   :  { %v227_v36 = vrot.slane %v226_v35, 1 }
 0x10f   :  { %v228_v37 = vadd.f32 %v227_v36, %v226_v35 }
 0x111   :  { %268 = vpush %v228_v37 }
 0x13a   :  { %s267_s0 = spop %266 }
 0x13b   :  { %v239_v40 = vstv %s267_s0 }
 0x142   :  { %s269_s1 = spop %268 }
 0x143   :  { %v237_v39 = vstv %s269_s1 }
 0x144   :  { %v238_v41 = vsel %vm236_vm8, %v237_v39, 0.0 }
 0x145   :  { %v240_v42 = vsel %vm234_vm9, %v239_v40, %v238_v41 }
 0x146   :  { %241 = vst [vmem:[%s331_s4] sm:$0xff] %v240_v42 }

</bundles_post_ra>
